<compile_context>
chip_gen: v5e
topology: v5e:2x2
jax: 0.10.0
libtpu: 0.0.40
codegen_flags: <defaults>
</compile_context>

<pallas_src>
import functools

import jax
import jax.numpy as jnp
import numpy as np
from jax.experimental import pallas as pl
from jax.experimental.pallas import tpu as pltpu

# ---- Duet hyperparameters (small but consistent with the module's constraints) ----
ARCH_TYPE = 2                                   # local + distributed
B = 2
MAX_QUERY_TERMS = 8                             # MQ
MAX_DOC_TERMS = 16                              # MD
NUM_HIDDEN_NODES = 32                           # H
NUM_NGRAPHS = 16                                # NG
POOLING_KERNEL_WIDTH_QUERY = MAX_QUERY_TERMS - 2                 # pooled length == 1
POOLING_KERNEL_WIDTH_DOC = 8
NUM_POOLING_WINDOWS_DOC = (MAX_DOC_TERMS - 2) - POOLING_KERNEL_WIDTH_DOC + 1
DROPOUT_RATE = 0.0                              # eval mode -> identity

MQ, MD, H, NG = MAX_QUERY_TERMS, MAX_DOC_TERMS, NUM_HIDDEN_NODES, NUM_NGRAPHS
LQ = MQ - 2                                     # conv(k=3) output length, query (6)
LD = MD - 2                                     # conv(k=3) output length, doc (14)
PKWD = POOLING_KERNEL_WIDTH_DOC                 # 8
NPW = NUM_POOLING_WINDOWS_DOC                   # 7

# ---- weight-slab layout: (rows, 32) bf16, every segment length a multiple of 16 ----
_SEGS = [
    ('wlc',  MD),        # local conv (k=1):      rows c,        cols h
    ('wlf1', MQ * H),    # local fc1:             rows q*H+h,    cols o
    ('wlf2', H),
    ('wqc',  3 * NG),    # dist-q conv (im2col):  rows k*NG+c,   cols h
    ('wqf',  H),
    ('wdc1', 3 * NG),    # dist-d conv1 (im2col)
    ('wdc2', H),         # dist-d conv2 (k=1)
    ('wds',  NPW * H),   # dist fc1:              rows j*H+h,    cols o
    ('wdf2', H),
    ('wc1',  H),
    ('wc2',  H),
    ('wc3',  H),         # final fc, tiled to H lanes (all lanes identical)
]
W_OFF = {}
_o = 0
for _name, _k in _SEGS:
    W_OFF[_name] = (_o, _k)
    _o += _k
W_ROWS = _o                                     # 816 rows total

B_IDX = {name: i for i, name in enumerate(
    ['bl_conv', 'bl_fc1', 'bl_fc2', 'bq_conv', 'bq_fc', 'bd_conv1',
     'bd_conv2', 'bdist_fc1', 'bdist_fc2', 'bc1', 'bc2', 'bc3'])}
B_ROWS = len(B_IDX)                             # 12 rows


# --------------------------------------------------------------------------------
# Pallas kernel: single invocation, whole batch.  MXU matmuls (bf16 operands, f32
# accum), tanh, sublane max-trees, lane/sublane concats.  No selector matmuls.
# --------------------------------------------------------------------------------
def duet_kernel(xl_ref, xq_ref, xd_ref, w_ref, b_ref, out_ref):
    bf16 = jnp.bfloat16
    dot = functools.partial(jnp.dot, preferred_element_type=jnp.float32)

    def W(name):                       # static, sublane-aligned slab slice (free)
        off, rows = W_OFF[name]
        return w_ref[off:off + rows, :]

    def bvec(name):                    # (1, 32) f32 bias row
        i = B_IDX[name]
        return b_ref[i:i + 1, :]

    # ---------------- local path --------------------------------------------------
    # conv(k=1) over all (q, b) rows at once: (MQ*B, MD) @ (MD, H)
    a = jnp.tanh(dot(xl_ref[...], W('wlc')) + bvec('bl_conv'))            # (MQ*B, H)
    # "Flatten" = lane-concat of per-q (B, H) slices -> (B, MQ*H); lanes q*H + h
    p_loc = jnp.concatenate([a[q * B:(q + 1) * B, :] for q in range(MQ)],
                            axis=1).astype(bf16)                          # (B, 256)
    h1 = jnp.tanh(dot(p_loc, W('wlf1')) + bvec('bl_fc1'))                 # (B, H), K=256
    h_local = jnp.tanh(dot(h1.astype(bf16), W('wlf2')) + bvec('bl_fc2'))  # (B, H)

    # ---------------- distributed query (rows are batch-interleaved: t*B + b) -----
    cq = jnp.tanh(dot(xq_ref[...], W('wqc')) + bvec('bq_conv'))           # (LQ*B, H)
    # MaxPool1d(LQ) -> length 1: log-depth max tree (no selector matmuls)
    u = jnp.maximum(cq[0:3 * B, :], cq[3 * B:6 * B, :])                   # {t, t+3}
    v = jnp.maximum(u[0:2 * B, :], u[B:3 * B, :])                         # {t,t+1,t+3,t+4}
    mq = jnp.maximum(v[0:B, :], u[2 * B:3 * B, :])                        # (B, H) full max
    h_dq = jnp.tanh(dot(mq.astype(bf16), W('wqf')) + bvec('bq_fc'))       # (B, H)

    # ---------------- distributed doc (rows t*B + b) -------------------------------
    cd = jnp.tanh(dot(xd_ref[...], W('wdc1')) + bvec('bd_conv1'))         # (LD*B, H)
    # MaxPool1d(8, stride=1) as a 3-level max tree; batch-interleaved rows keep the
    # shifts batch-consistent and leave exactly the NPW valid windows on top.
    t1 = jnp.maximum(cd[0:13 * B, :], cd[B:14 * B, :])                    # width 2
    t2 = jnp.maximum(t1[0:11 * B, :], t1[2 * B:13 * B, :])                # width 4
    pd = jnp.maximum(t2[0:NPW * B, :], t2[4 * B:11 * B, :])               # width 8 -> (NPW*B, H)
    dd = jnp.tanh(dot(pd.astype(bf16), W('wdc2')) + bvec('bd_conv2'))     # (NPW*B, H)

    # ---------------- distributed combination --------------------------------------
    hdq_rep = jnp.concatenate([h_dq] * NPW, axis=0)                       # (NPW*B, H), row j*B+b
    prod = dd * hdq_rep                                                   # (NPW*B, H)
    # "Flatten" = lane-concat of per-window (B, H) slices -> (B, NPW*H); lanes j*H + h
    p_dist = jnp.concatenate([prod[j * B:(j + 1) * B, :] for j in range(NPW)],
                             axis=1).astype(bf16)                         # (B, 224)
    hd1 = jnp.tanh(dot(p_dist, W('wds')) + bvec('bdist_fc1'))             # (B, H), K=224
    h_dist = jnp.tanh(dot(hd1.astype(bf16), W('wdf2')) + bvec('bdist_fc2'))

    # ---------------- final combination (ARCH_TYPE == 2) ---------------------------
    h = (h_local + h_dist).astype(bf16)
    c1 = jnp.tanh(dot(h, W('wc1')) + bvec('bc1')).astype(bf16)
    c2 = jnp.tanh(dot(c1, W('wc2')) + bvec('bc2')).astype(bf16)
    out_ref[...] = jnp.tanh(dot(c2, W('wc3')) + bvec('bc3'))              # (B, H), lanes identical


# --------------------------------------------------------------------------------
# One-time parameter preparation (hoisted out of the per-call path)
# --------------------------------------------------------------------------------
def prepare_params(p):
    """PyTorch-layout params -> (weight slab bf16 (816,32), bias slab f32 (12,32))."""
    pieces = {
        'wlc':  p['Wl_conv'][:, :, 0].T,                                           # (MD, H)
        'wlf1': p['Wl_fc1'].reshape(H, H, MQ).transpose(2, 1, 0).reshape(MQ * H, H),
        'wlf2': p['Wl_fc2'].T,
        'wqc':  p['Wq_conv'].transpose(2, 1, 0).reshape(3 * NG, H),                 # rows k*NG+c
        'wqf':  p['Wq_fc'].T,
        'wdc1': p['Wd_conv1'].transpose(2, 1, 0).reshape(3 * NG, H),
        'wdc2': p['Wd_conv2'][:, :, 0].T,
        'wds':  p['Wdist_fc1'].reshape(H, H, NPW).transpose(2, 1, 0).reshape(NPW * H, H),
        'wdf2': p['Wdist_fc2'].T,
        'wc1':  p['Wc1'].T,
        'wc2':  p['Wc2'].T,
        'wc3':  jnp.tile(p['Wc3'].T, (1, H)),                                       # (H, H) tiled
    }
    wslab = jnp.concatenate([pieces[n] for n, _ in _SEGS], axis=0).astype(jnp.bfloat16)
    assert wslab.shape == (W_ROWS, H)

    biases = {
        'bl_conv': p['bl_conv'], 'bl_fc1': p['bl_fc1'], 'bl_fc2': p['bl_fc2'],
        'bq_conv': p['bq_conv'], 'bq_fc': p['bq_fc'],
        'bd_conv1': p['bd_conv1'], 'bd_conv2': p['bd_conv2'],
        'bdist_fc1': p['bdist_fc1'], 'bdist_fc2': p['bdist_fc2'],
        'bc1': p['bc1'], 'bc2': p['bc2'],
        'bc3': jnp.tile(p['bc3'], H),
    }
    order = sorted(B_IDX, key=B_IDX.get)
    bslab = jnp.stack([biases[n] for n in order], axis=0).astype(jnp.float32)
    assert bslab.shape == (B_ROWS, H)
    return jax.device_put(wslab), jax.device_put(bslab)


# --------------------------------------------------------------------------------
# Per-call wrapper: only im2col / row-interleave + one grid-less pallas_call
# --------------------------------------------------------------------------------
def _im2col_k3(x_ncl):
    """(B, C, L) NCL -> ((L-2)*B, 3*C); rows t*B+b (batch-interleaved), cols k*C+c."""
    Bn, C, L = x_ncl.shape
    lo = L - 2
    x_nlc = jnp.transpose(x_ncl, (0, 2, 1))                              # (B, L, C)
    win = jnp.concatenate([x_nlc[:, k:k + lo, :] for k in range(3)], axis=2)  # (B, lo, 3C)
    return jnp.transpose(win, (1, 0, 2)).reshape(lo * Bn, 3 * C)


@jax.jit
def duet_forward(x_local, x_dist_q, x_dist_d, wslab, bslab):
    bf16 = jnp.bfloat16
    # local input: rows q*B+b, cols c  (PyTorch NCL -> matmul-friendly layout)
    xl = jnp.transpose(x_local, (2, 0, 1)).reshape(MQ * B, MD).astype(bf16)   # (16, 16)
    xq = _im2col_k3(x_dist_q).astype(bf16)                                    # (12, 48)
    xd = _im2col_k3(x_dist_d).astype(bf16)                                    # (28, 48)

    vmem = lambda: pl.BlockSpec(memory_space=pltpu.MemorySpace.VMEM)
    out = pl.pallas_call(
        duet_kernel,
        out_shape=jax.ShapeDtypeStruct((B, H), jnp.float32),
        in_specs=[vmem() for _ in range(5)],
        out_specs=vmem(),
    )(xl, xq, xd, wslab, bslab)
    return out[:, :1]                                                         # (B, 1)


# --------------------------------------------------------------------------------
# Deterministic parameter init (PyTorch-like uniform(+-1/sqrt(fan_in)))
# --------------------------------------------------------------------------------
def init_params(key):
    ks = jax.random.split(key, 24)

    def u(k, shape, fan_in):
        bound = 1.0 / np.sqrt(fan_in)
        return jax.random.uniform(k, shape, jnp.float32, -bound, bound)

    return {
        'Wl_conv': u(ks[0], (H, MD, 1), MD),        'bl_conv': u(ks[1], (H,), MD),
        'Wl_fc1':  u(ks[2], (H, H * MQ), H * MQ),   'bl_fc1':  u(ks[3], (H,), H * MQ),
        'Wl_fc2':  u(ks[4], (H, H), H),             'bl_fc2':  u(ks[5], (H,), H),
        'Wq_conv': u(ks[6], (H, NG, 3), NG * 3),    'bq_conv': u(ks[7], (H,), NG * 3),
        'Wq_fc':   u(ks[8], (H, H), H),             'bq_fc':   u(ks[9], (H,), H),
        'Wd_conv1': u(ks[10], (H, NG, 3), NG * 3),  'bd_conv1': u(ks[11], (H,), NG * 3),
        'Wd_conv2': u(ks[12], (H, H, 1), H),        'bd_conv2': u(ks[13], (H,), H),
        'Wdist_fc1': u(ks[14], (H, H * NPW), H * NPW), 'bdist_fc1': u(ks[15], (H,), H * NPW),
        'Wdist_fc2': u(ks[16], (H, H), H),          'bdist_fc2': u(ks[17], (H,), H),
        'Wc1': u(ks[18], (H, H), H),                'bc1': u(ks[19], (H,), H),
        'Wc2': u(ks[20], (H, H), H),                'bc2': u(ks[21], (H,), H),
        'Wc3': u(ks[22], (1, H), H),                'bc3': u(ks[23], (1,), H),
    }


# --------------------------------------------------------------------------------
# Pure-JAX f32 reference (mirrors the PyTorch forward exactly, eval-mode dropout)
# --------------------------------------------------------------------------------
def duet_reference(x_local, x_dist_q, x_dist_d, p):
    a = jnp.tanh(jnp.einsum('hc,bcq->bhq', p['Wl_conv'][:, :, 0], x_local)
                 + p['bl_conv'][None, :, None])
    h1 = jnp.tanh(a.reshape(B, H * MQ) @ p['Wl_fc1'].T + p['bl_fc1'])
    h_local = jnp.tanh(h1 @ p['Wl_fc2'].T + p['bl_fc2'])

    sq = sum(jnp.einsum('hc,bct->bht', p['Wq_conv'][:, :, k], x_dist_q[:, :, k:k + LQ])
             for k in range(3))
    cq = jnp.tanh(sq + p['bq_conv'][None, :, None])
    mq = jnp.max(cq, axis=2)                                           # MaxPool1d(LQ) -> len 1
    h_dq = jnp.tanh(mq @ p['Wq_fc'].T + p['bq_fc'])

    sd = sum(jnp.einsum('hc,bct->bht', p['Wd_conv1'][:, :, k], x_dist_d[:, :, k:k + LD])
             for k in range(3))
    cd = jnp.tanh(sd + p['bd_conv1'][None, :, None])
    pdw = jnp.stack([cd[:, :, i:i + NPW] for i in range(PKWD)], axis=0).max(axis=0)
    dd = jnp.tanh(jnp.einsum('hc,bcj->bhj', p['Wd_conv2'][:, :, 0], pdw)
                  + p['bd_conv2'][None, :, None])

    prod = h_dq[:, :, None] * dd
    hd1 = jnp.tanh(prod.reshape(B, H * NPW) @ p['Wdist_fc1'].T + p['bdist_fc1'])
    h_dist = jnp.tanh(hd1 @ p['Wdist_fc2'].T + p['bdist_fc2'])

    h = h_local + h_dist
    c1 = jnp.tanh(h @ p['Wc1'].T + p['bc1'])
    c2 = jnp.tanh(c1 @ p['Wc2'].T + p['bc2'])
    return jnp.tanh(c2 @ p['Wc3'].T + p['bc3'])                        # (B, 1)


if __name__ == "__main__":
    key = jax.random.PRNGKey(0)
    kp, kx1, kx2, kx3 = jax.random.split(key, 4)
    params = init_params(kp)
    wslab, bslab = prepare_params(params)        # one-time derived-weight plumbing

    x_local = jax.random.normal(kx1, (B, MD, MQ), jnp.float32)     # (2, 16, 8)
    x_dist_q = jax.random.normal(kx2, (B, NG, MQ), jnp.float32)    # (2, 16, 8)
    x_dist_d = jax.random.normal(kx3, (B, NG, MD), jnp.float32)    # (2, 16, 16)

    y = duet_forward(x_local, x_dist_q, x_dist_d, wslab, bslab)
    y = jax.block_until_ready(y)

    y_ref = duet_reference(x_local, x_dist_q, x_dist_d, params)
    assert y.shape == (B, 1)
    # Tolerance widened vs. the f32 reference because MXU operands are bf16.
    np.testing.assert_allclose(np.asarray(y), np.asarray(y_ref), rtol=3e-2, atol=3e-2)
    print("KERNEL_OK")
</pallas_src>

<mosaic_0001>
module attributes {stable_mosaic.version = 11 : i64} {
  func.func @duet_kernel(%arg0: memref<16x16xbf16, #tpu.memory_space<vmem>>, %arg1: memref<12x48xbf16, #tpu.memory_space<vmem>>, %arg2: memref<28x48xbf16, #tpu.memory_space<vmem>>, %arg3: memref<816x32xbf16, #tpu.memory_space<vmem>>, %arg4: memref<12x32xf32, #tpu.memory_space<vmem>>, %arg5: memref<2x32xf32, #tpu.memory_space<vmem>>) attributes {dimension_semantics = [], scalar_prefetch = 0 : i64, scratch_operands = 0 : i64, tpu.core_type = #tpu.core_type<tc>} {
    %c0 = arith.constant 0 : index
    %c0_0 = arith.constant 0 : index
    %0 = vector.load %arg0[%c0, %c0_0] : memref<16x16xbf16, #tpu.memory_space<vmem>>, vector<16x16xbf16>
    %c0_1 = arith.constant 0 : index
    %c0_2 = arith.constant 0 : index
    %1 = vector.load %arg3[%c0_1, %c0_2] : memref<816x32xbf16, #tpu.memory_space<vmem>>, vector<16x32xbf16>
    %cst = arith.constant dense<0.000000e+00> : vector<16x32xf32>
    %2 = tpu.matmul %0, %1, %cst {dimension_numbers = #tpu.dot_dimension_numbers<[1], [0], [0], [1], [0, 0, 1, 1], [], []>} : vector<16x16xbf16>, vector<16x32xbf16>, vector<16x32xf32> -> vector<16x32xf32>
    %c0_3 = arith.constant 0 : index
    %c0_4 = arith.constant 0 : index
    %3 = vector.load %arg4[%c0_3, %c0_4] : memref<12x32xf32, #tpu.memory_space<vmem>>, vector<1x32xf32>
    %4 = vector.broadcast %3 : vector<1x32xf32> to vector<16x32xf32>
    %5 = arith.addf %2, %4 : vector<16x32xf32>
    %6 = math.tanh %5 : vector<16x32xf32>
    %7 = vector.extract_strided_slice %6 {offsets = [0, 0], sizes = [2, 32], strides = [1, 1]} : vector<16x32xf32> to vector<2x32xf32>
    %8 = vector.extract_strided_slice %6 {offsets = [2, 0], sizes = [2, 32], strides = [1, 1]} : vector<16x32xf32> to vector<2x32xf32>
    %9 = vector.extract_strided_slice %6 {offsets = [4, 0], sizes = [2, 32], strides = [1, 1]} : vector<16x32xf32> to vector<2x32xf32>
    %10 = vector.extract_strided_slice %6 {offsets = [6, 0], sizes = [2, 32], strides = [1, 1]} : vector<16x32xf32> to vector<2x32xf32>
    %11 = vector.extract_strided_slice %6 {offsets = [8, 0], sizes = [2, 32], strides = [1, 1]} : vector<16x32xf32> to vector<2x32xf32>
    %12 = vector.extract_strided_slice %6 {offsets = [10, 0], sizes = [2, 32], strides = [1, 1]} : vector<16x32xf32> to vector<2x32xf32>
    %13 = vector.extract_strided_slice %6 {offsets = [12, 0], sizes = [2, 32], strides = [1, 1]} : vector<16x32xf32> to vector<2x32xf32>
    %14 = vector.extract_strided_slice %6 {offsets = [14, 0], sizes = [2, 32], strides = [1, 1]} : vector<16x32xf32> to vector<2x32xf32>
    %15 = tpu.concatenate %7, %8, %9, %10, %11, %12, %13, %14 in 1 : vector<2x32xf32>, vector<2x32xf32>, vector<2x32xf32>, vector<2x32xf32>, vector<2x32xf32>, vector<2x32xf32>, vector<2x32xf32>, vector<2x32xf32> -> vector<2x256xf32>
    %16 = arith.truncf %15 : vector<2x256xf32> to vector<2x256xbf16>
    %c16 = arith.constant 16 : index
    %c0_5 = arith.constant 0 : index
    %17 = vector.load %arg3[%c16, %c0_5] : memref<816x32xbf16, #tpu.memory_space<vmem>>, vector<256x32xbf16>
    %cst_6 = arith.constant dense<0.000000e+00> : vector<2x32xf32>
    %18 = tpu.matmul %16, %17, %cst_6 {dimension_numbers = #tpu.dot_dimension_numbers<[1], [0], [0], [1], [0, 0, 1, 1], [], []>} : vector<2x256xbf16>, vector<256x32xbf16>, vector<2x32xf32> -> vector<2x32xf32>
    %c1 = arith.constant 1 : index
    %c0_7 = arith.constant 0 : index
    %19 = vector.load %arg4[%c1, %c0_7] : memref<12x32xf32, #tpu.memory_space<vmem>>, vector<1x32xf32>
    %20 = vector.broadcast %19 : vector<1x32xf32> to vector<2x32xf32>
    %21 = arith.addf %18, %20 : vector<2x32xf32>
    %22 = math.tanh %21 : vector<2x32xf32>
    %23 = arith.truncf %22 : vector<2x32xf32> to vector<2x32xbf16>
    %c272 = arith.constant 272 : index
    %c0_8 = arith.constant 0 : index
    %24 = vector.load %arg3[%c272, %c0_8] : memref<816x32xbf16, #tpu.memory_space<vmem>>, vector<32x32xbf16>
    %cst_9 = arith.constant dense<0.000000e+00> : vector<2x32xf32>
    %25 = tpu.matmul %23, %24, %cst_9 {dimension_numbers = #tpu.dot_dimension_numbers<[1], [0], [0], [1], [0, 0, 1, 1], [], []>} : vector<2x32xbf16>, vector<32x32xbf16>, vector<2x32xf32> -> vector<2x32xf32>
    %c2 = arith.constant 2 : index
    %c0_10 = arith.constant 0 : index
    %26 = vector.load %arg4[%c2, %c0_10] : memref<12x32xf32, #tpu.memory_space<vmem>>, vector<1x32xf32>
    %27 = vector.broadcast %26 : vector<1x32xf32> to vector<2x32xf32>
    %28 = arith.addf %25, %27 : vector<2x32xf32>
    %29 = math.tanh %28 : vector<2x32xf32>
    %c0_11 = arith.constant 0 : index
    %c0_12 = arith.constant 0 : index
    %30 = vector.load %arg1[%c0_11, %c0_12] : memref<12x48xbf16, #tpu.memory_space<vmem>>, vector<12x48xbf16>
    %c304 = arith.constant 304 : index
    %c0_13 = arith.constant 0 : index
    %31 = vector.load %arg3[%c304, %c0_13] : memref<816x32xbf16, #tpu.memory_space<vmem>>, vector<48x32xbf16>
    %cst_14 = arith.constant dense<0.000000e+00> : vector<12x32xf32>
    %32 = tpu.matmul %30, %31, %cst_14 {dimension_numbers = #tpu.dot_dimension_numbers<[1], [0], [0], [1], [0, 0, 1, 1], [], []>} : vector<12x48xbf16>, vector<48x32xbf16>, vector<12x32xf32> -> vector<12x32xf32>
    %c3 = arith.constant 3 : index
    %c0_15 = arith.constant 0 : index
    %33 = vector.load %arg4[%c3, %c0_15] : memref<12x32xf32, #tpu.memory_space<vmem>>, vector<1x32xf32>
    %34 = vector.broadcast %33 : vector<1x32xf32> to vector<12x32xf32>
    %35 = arith.addf %32, %34 : vector<12x32xf32>
    %36 = math.tanh %35 : vector<12x32xf32>
    %37 = vector.extract_strided_slice %36 {offsets = [0, 0], sizes = [6, 32], strides = [1, 1]} : vector<12x32xf32> to vector<6x32xf32>
    %38 = vector.extract_strided_slice %36 {offsets = [6, 0], sizes = [6, 32], strides = [1, 1]} : vector<12x32xf32> to vector<6x32xf32>
    %39 = arith.maximumf %37, %38 : vector<6x32xf32>
    %40 = vector.extract_strided_slice %39 {offsets = [0, 0], sizes = [4, 32], strides = [1, 1]} : vector<6x32xf32> to vector<4x32xf32>
    %41 = vector.extract_strided_slice %39 {offsets = [2, 0], sizes = [4, 32], strides = [1, 1]} : vector<6x32xf32> to vector<4x32xf32>
    %42 = arith.maximumf %40, %41 : vector<4x32xf32>
    %43 = vector.extract_strided_slice %42 {offsets = [0, 0], sizes = [2, 32], strides = [1, 1]} : vector<4x32xf32> to vector<2x32xf32>
    %44 = vector.extract_strided_slice %39 {offsets = [4, 0], sizes = [2, 32], strides = [1, 1]} : vector<6x32xf32> to vector<2x32xf32>
    %45 = arith.maximumf %43, %44 : vector<2x32xf32>
    %46 = arith.truncf %45 : vector<2x32xf32> to vector<2x32xbf16>
    %c352 = arith.constant 352 : index
    %c0_16 = arith.constant 0 : index
    %47 = vector.load %arg3[%c352, %c0_16] : memref<816x32xbf16, #tpu.memory_space<vmem>>, vector<32x32xbf16>
    %cst_17 = arith.constant dense<0.000000e+00> : vector<2x32xf32>
    %48 = tpu.matmul %46, %47, %cst_17 {dimension_numbers = #tpu.dot_dimension_numbers<[1], [0], [0], [1], [0, 0, 1, 1], [], []>} : vector<2x32xbf16>, vector<32x32xbf16>, vector<2x32xf32> -> vector<2x32xf32>
    %c4 = arith.constant 4 : index
    %c0_18 = arith.constant 0 : index
    %49 = vector.load %arg4[%c4, %c0_18] : memref<12x32xf32, #tpu.memory_space<vmem>>, vector<1x32xf32>
    %50 = vector.broadcast %49 : vector<1x32xf32> to vector<2x32xf32>
    %51 = arith.addf %48, %50 : vector<2x32xf32>
    %52 = math.tanh %51 : vector<2x32xf32>
    %c0_19 = arith.constant 0 : index
    %c0_20 = arith.constant 0 : index
    %53 = vector.load %arg2[%c0_19, %c0_20] : memref<28x48xbf16, #tpu.memory_space<vmem>>, vector<28x48xbf16>
    %c384 = arith.constant 384 : index
    %c0_21 = arith.constant 0 : index
    %54 = vector.load %arg3[%c384, %c0_21] : memref<816x32xbf16, #tpu.memory_space<vmem>>, vector<48x32xbf16>
    %cst_22 = arith.constant dense<0.000000e+00> : vector<28x32xf32>
    %55 = tpu.matmul %53, %54, %cst_22 {dimension_numbers = #tpu.dot_dimension_numbers<[1], [0], [0], [1], [0, 0, 1, 1], [], []>} : vector<28x48xbf16>, vector<48x32xbf16>, vector<28x32xf32> -> vector<28x32xf32>
    %c5 = arith.constant 5 : index
    %c0_23 = arith.constant 0 : index
    %56 = vector.load %arg4[%c5, %c0_23] : memref<12x32xf32, #tpu.memory_space<vmem>>, vector<1x32xf32>
    %57 = vector.broadcast %56 : vector<1x32xf32> to vector<28x32xf32>
    %58 = arith.addf %55, %57 : vector<28x32xf32>
    %59 = math.tanh %58 : vector<28x32xf32>
    %60 = vector.extract_strided_slice %59 {offsets = [0, 0], sizes = [26, 32], strides = [1, 1]} : vector<28x32xf32> to vector<26x32xf32>
    %61 = vector.extract_strided_slice %59 {offsets = [2, 0], sizes = [26, 32], strides = [1, 1]} : vector<28x32xf32> to vector<26x32xf32>
    %62 = arith.maximumf %60, %61 : vector<26x32xf32>
    %63 = vector.extract_strided_slice %62 {offsets = [0, 0], sizes = [22, 32], strides = [1, 1]} : vector<26x32xf32> to vector<22x32xf32>
    %64 = vector.extract_strided_slice %62 {offsets = [4, 0], sizes = [22, 32], strides = [1, 1]} : vector<26x32xf32> to vector<22x32xf32>
    %65 = arith.maximumf %63, %64 : vector<22x32xf32>
    %66 = vector.extract_strided_slice %65 {offsets = [0, 0], sizes = [14, 32], strides = [1, 1]} : vector<22x32xf32> to vector<14x32xf32>
    %67 = vector.extract_strided_slice %65 {offsets = [8, 0], sizes = [14, 32], strides = [1, 1]} : vector<22x32xf32> to vector<14x32xf32>
    %68 = arith.maximumf %66, %67 : vector<14x32xf32>
    %69 = arith.truncf %68 : vector<14x32xf32> to vector<14x32xbf16>
    %c432 = arith.constant 432 : index
    %c0_24 = arith.constant 0 : index
    %70 = vector.load %arg3[%c432, %c0_24] : memref<816x32xbf16, #tpu.memory_space<vmem>>, vector<32x32xbf16>
    %cst_25 = arith.constant dense<0.000000e+00> : vector<14x32xf32>
    %71 = tpu.matmul %69, %70, %cst_25 {dimension_numbers = #tpu.dot_dimension_numbers<[1], [0], [0], [1], [0, 0, 1, 1], [], []>} : vector<14x32xbf16>, vector<32x32xbf16>, vector<14x32xf32> -> vector<14x32xf32>
    %c6 = arith.constant 6 : index
    %c0_26 = arith.constant 0 : index
    %72 = vector.load %arg4[%c6, %c0_26] : memref<12x32xf32, #tpu.memory_space<vmem>>, vector<1x32xf32>
    %73 = vector.broadcast %72 : vector<1x32xf32> to vector<14x32xf32>
    %74 = arith.addf %71, %73 : vector<14x32xf32>
    %75 = math.tanh %74 : vector<14x32xf32>
    %76 = tpu.concatenate %52, %52, %52, %52, %52, %52, %52 in 0 : vector<2x32xf32>, vector<2x32xf32>, vector<2x32xf32>, vector<2x32xf32>, vector<2x32xf32>, vector<2x32xf32>, vector<2x32xf32> -> vector<14x32xf32>
    %77 = arith.mulf %75, %76 : vector<14x32xf32>
    %78 = vector.extract_strided_slice %77 {offsets = [0, 0], sizes = [2, 32], strides = [1, 1]} : vector<14x32xf32> to vector<2x32xf32>
    %79 = vector.extract_strided_slice %77 {offsets = [2, 0], sizes = [2, 32], strides = [1, 1]} : vector<14x32xf32> to vector<2x32xf32>
    %80 = vector.extract_strided_slice %77 {offsets = [4, 0], sizes = [2, 32], strides = [1, 1]} : vector<14x32xf32> to vector<2x32xf32>
    %81 = vector.extract_strided_slice %77 {offsets = [6, 0], sizes = [2, 32], strides = [1, 1]} : vector<14x32xf32> to vector<2x32xf32>
    %82 = vector.extract_strided_slice %77 {offsets = [8, 0], sizes = [2, 32], strides = [1, 1]} : vector<14x32xf32> to vector<2x32xf32>
    %83 = vector.extract_strided_slice %77 {offsets = [10, 0], sizes = [2, 32], strides = [1, 1]} : vector<14x32xf32> to vector<2x32xf32>
    %84 = vector.extract_strided_slice %77 {offsets = [12, 0], sizes = [2, 32], strides = [1, 1]} : vector<14x32xf32> to vector<2x32xf32>
    %85 = tpu.concatenate %78, %79, %80, %81, %82, %83, %84 in 1 : vector<2x32xf32>, vector<2x32xf32>, vector<2x32xf32>, vector<2x32xf32>, vector<2x32xf32>, vector<2x32xf32>, vector<2x32xf32> -> vector<2x224xf32>
    %86 = arith.truncf %85 : vector<2x224xf32> to vector<2x224xbf16>
    %c464 = arith.constant 464 : index
    %c0_27 = arith.constant 0 : index
    %87 = vector.load %arg3[%c464, %c0_27] : memref<816x32xbf16, #tpu.memory_space<vmem>>, vector<224x32xbf16>
    %cst_28 = arith.constant dense<0.000000e+00> : vector<2x32xf32>
    %88 = tpu.matmul %86, %87, %cst_28 {dimension_numbers = #tpu.dot_dimension_numbers<[1], [0], [0], [1], [0, 0, 1, 1], [], []>} : vector<2x224xbf16>, vector<224x32xbf16>, vector<2x32xf32> -> vector<2x32xf32>
    %c7 = arith.constant 7 : index
    %c0_29 = arith.constant 0 : index
    %89 = vector.load %arg4[%c7, %c0_29] : memref<12x32xf32, #tpu.memory_space<vmem>>, vector<1x32xf32>
    %90 = vector.broadcast %89 : vector<1x32xf32> to vector<2x32xf32>
    %91 = arith.addf %88, %90 : vector<2x32xf32>
    %92 = math.tanh %91 : vector<2x32xf32>
    %93 = arith.truncf %92 : vector<2x32xf32> to vector<2x32xbf16>
    %c688 = arith.constant 688 : index
    %c0_30 = arith.constant 0 : index
    %94 = vector.load %arg3[%c688, %c0_30] : memref<816x32xbf16, #tpu.memory_space<vmem>>, vector<32x32xbf16>
    %cst_31 = arith.constant dense<0.000000e+00> : vector<2x32xf32>
    %95 = tpu.matmul %93, %94, %cst_31 {dimension_numbers = #tpu.dot_dimension_numbers<[1], [0], [0], [1], [0, 0, 1, 1], [], []>} : vector<2x32xbf16>, vector<32x32xbf16>, vector<2x32xf32> -> vector<2x32xf32>
    %c8 = arith.constant 8 : index
    %c0_32 = arith.constant 0 : index
    %96 = vector.load %arg4[%c8, %c0_32] : memref<12x32xf32, #tpu.memory_space<vmem>>, vector<1x32xf32>
    %97 = vector.broadcast %96 : vector<1x32xf32> to vector<2x32xf32>
    %98 = arith.addf %95, %97 : vector<2x32xf32>
    %99 = math.tanh %98 : vector<2x32xf32>
    %100 = arith.addf %29, %99 : vector<2x32xf32>
    %101 = arith.truncf %100 : vector<2x32xf32> to vector<2x32xbf16>
    %c720 = arith.constant 720 : index
    %c0_33 = arith.constant 0 : index
    %102 = vector.load %arg3[%c720, %c0_33] : memref<816x32xbf16, #tpu.memory_space<vmem>>, vector<32x32xbf16>
    %cst_34 = arith.constant dense<0.000000e+00> : vector<2x32xf32>
    %103 = tpu.matmul %101, %102, %cst_34 {dimension_numbers = #tpu.dot_dimension_numbers<[1], [0], [0], [1], [0, 0, 1, 1], [], []>} : vector<2x32xbf16>, vector<32x32xbf16>, vector<2x32xf32> -> vector<2x32xf32>
    %c9 = arith.constant 9 : index
    %c0_35 = arith.constant 0 : index
    %104 = vector.load %arg4[%c9, %c0_35] : memref<12x32xf32, #tpu.memory_space<vmem>>, vector<1x32xf32>
    %105 = vector.broadcast %104 : vector<1x32xf32> to vector<2x32xf32>
    %106 = arith.addf %103, %105 : vector<2x32xf32>
    %107 = math.tanh %106 : vector<2x32xf32>
    %108 = arith.truncf %107 : vector<2x32xf32> to vector<2x32xbf16>
    %c752 = arith.constant 752 : index
    %c0_36 = arith.constant 0 : index
    %109 = vector.load %arg3[%c752, %c0_36] : memref<816x32xbf16, #tpu.memory_space<vmem>>, vector<32x32xbf16>
    %cst_37 = arith.constant dense<0.000000e+00> : vector<2x32xf32>
    %110 = tpu.matmul %108, %109, %cst_37 {dimension_numbers = #tpu.dot_dimension_numbers<[1], [0], [0], [1], [0, 0, 1, 1], [], []>} : vector<2x32xbf16>, vector<32x32xbf16>, vector<2x32xf32> -> vector<2x32xf32>
    %c10 = arith.constant 10 : index
    %c0_38 = arith.constant 0 : index
    %111 = vector.load %arg4[%c10, %c0_38] : memref<12x32xf32, #tpu.memory_space<vmem>>, vector<1x32xf32>
    %112 = vector.broadcast %111 : vector<1x32xf32> to vector<2x32xf32>
    %113 = arith.addf %110, %112 : vector<2x32xf32>
    %114 = math.tanh %113 : vector<2x32xf32>
    %115 = arith.truncf %114 : vector<2x32xf32> to vector<2x32xbf16>
    %c784 = arith.constant 784 : index
    %c0_39 = arith.constant 0 : index
    %116 = vector.load %arg3[%c784, %c0_39] : memref<816x32xbf16, #tpu.memory_space<vmem>>, vector<32x32xbf16>
    %cst_40 = arith.constant dense<0.000000e+00> : vector<2x32xf32>
    %117 = tpu.matmul %115, %116, %cst_40 {dimension_numbers = #tpu.dot_dimension_numbers<[1], [0], [0], [1], [0, 0, 1, 1], [], []>} : vector<2x32xbf16>, vector<32x32xbf16>, vector<2x32xf32> -> vector<2x32xf32>
    %c11 = arith.constant 11 : index
    %c0_41 = arith.constant 0 : index
    %118 = vector.load %arg4[%c11, %c0_41] : memref<12x32xf32, #tpu.memory_space<vmem>>, vector<1x32xf32>
    %119 = vector.broadcast %118 : vector<1x32xf32> to vector<2x32xf32>
    %120 = arith.addf %117, %119 : vector<2x32xf32>
    %121 = math.tanh %120 : vector<2x32xf32>
    %c0_42 = arith.constant 0 : index
    %c0_43 = arith.constant 0 : index
    %122 = vector.load %arg5[%c0_42, %c0_43] : memref<2x32xf32, #tpu.memory_space<vmem>>, vector<2x32xf32>
    tpu.vector_store %arg5[%c0_42, %c0_43], %121 {strides = array<i32>} : memref<2x32xf32, #tpu.memory_space<vmem>>, vector<2x32xf32>,
    return
  }
}

</mosaic_0001>

<bundles_post_ra>
// kernel: duet_forward.1
= control target key start
LH: loop header
LB: loop body
LE: loop exit
PB: predicated region body
PF: predicated region fallthrough
CT: control target
= control target key end

     0   :  { %vm38_vm0 = vcmask 130048   ;;  %vm321_vm1 = vcmask 392192   ;;  %s1233_s29 = smov 96   ;;  %s1235_s7 = smov 64   ;;  %vm84_vm2 = vcmask 261120   ;;  %vm86_vm3 = vcmask 523264   ;;  %s1518_s3 = inlined_call_operand.vmem [shape: bf16[816,32], index: 3, kind: input, shape index: {}]   ;;  %s1519_s0 = inlined_call_operand.vmem [shape: bf16[16,16], index: 0, kind: input, shape index: {}]   ;;  %s1520_s4 = inlined_call_operand.vmem [shape: f32[12,32], index: 4, kind: input, shape index: {}]   ;;  %s1521_s1 = inlined_call_operand.vmem [shape: bf16[12,48], index: 1, kind: input, shape index: {}]   ;;  %s1522_s2 = inlined_call_operand.vmem [shape: bf16[28,48], index: 2, kind: input, shape index: {}]   ;;  %s1523_s5 = inlined_call_operand.vmem [shape: f32[2,32], index: 5, kind: output, shape index: {}]  }
   0x1   :  { %v1108_v0 = vld [vmem:[%s1518_s3] sm:$0xff]  ;;  %v1130_v2 = vld [vmem:[%s1518_s3 + $0xa8] sm:$0xff]  ;;  %v1115_v8 = vld [vmem:[%s1518_s3 + $0x38] sm:$0xff]  ;;  %vm88_vm4 = vcmask 785408   ;;  %vm343_vm5 = vcmask 1041408   ;;  %vm465_vm6 = vcmask 1045504  }
   0x2   :  { %v1107_v1 = vld [vmem:[%s1519_s0] sm:$0xff]  ;;  %49 = vmatpush.bf16.msra.mxu0 %v1108_v0  ;;  %v1123_v9 = vld [vmem:[%s1518_s3 + $0x78] sm:$0xff]  ;;  %v1137_v14 = vld [vmem:[%s1518_s3 + $0xd0] sm:$0xff]  ;;  %s1234_s0 = smov 32   ;;  %vm485_vm7 = vcmask 1043456   ;;  %vm869_vm8 = vcmask 254976  }
   0x3   :  { %v1129_v4 = vld [vmem:[%s1518_s3 + $0xa0] sm:$0xff]  ;;  %v1128_v10 = vld [vmem:[%s1518_s3 + $0x98] sm:$0xff]  ;;  %v1114_v15 = vld [vmem:[%s1518_s3 + $0x30] sm:$0xff] }
   0x4   :  { %v1116_v5 = vld [vmem:[%s1518_s3 + $0x40] sm:$0xff]  ;;  %v1122_v16 = vld [vmem:[%s1518_s3 + $0x70] sm:$0xff]  ;;  %v1136_v20 = vld [vmem:[%s1518_s3 + $0xc8] sm:$0xff] }
   0x5   :  { %883 = vmatmul.msk.bf16.vlgmr.msra.gmra.mxu0 %vm38_vm0, %v1107_v1  ;;  %v1124_v6 = vld [vmem:[%s1518_s3 + $0x80] sm:$0xff]  ;;  %225 = vmatpush.bf16.msra.mxu1 %v1116_v5  ;;  %v1113_v21 = vld [vmem:[%s1518_s3 + $0x28] sm:$0xff]  ;;  %v1111_v40 = vld [vmem:[%s1518_s3 + $0x18] sm:$0xff] }
   0x6   :  { %330 = vmatpush.bf16.msrb.mxu0 %v1130_v2  ;;  %v1185_v7 = vld [vmem:[%s1520_s4] ss:$0 sm:$0xff]  ;;  %238 = vmatpush.bf16.msra.mxu2 %v1124_v6  ;;  %v1127_v12 = vld [vmem:[%s1521_s1] sm:$0x30]  ;;  %v1121_v22 = vld [vmem:[%s1518_s3 + $0x68] sm:$0xff] }
   0x7   :  { %v959_v11 = vld [vmem:[%s1521_s1] sm:$0xf]  ;;  %v989_v37 = vld [vmem:[%s1522_s2 + $0x8] sm:$0xf]  ;;  %v1134_v38 = vld [vmem:[%s1522_s2 + $0x8] sm:$0x30] }
   0x8   :  { %v960_v17 = vor.u32 %v1127_v12, %v959_v11  ;;  %v1135_v23 = vld [vmem:[%s1518_s3 + $0xc0] sm:$0xff]  ;;  %v990_v39 = vor.u32 %v1134_v38, %v989_v37  ;;  %v1119_v41 = vld [vmem:[%s1518_s3 + $0x58] sm:$0xff]  ;;  %v1110_v42 = vld [vmem:[%s1518_s3 + $0x10] sm:$0xff] }
   0x9   :  { %226 = vmatpush.bf16.msra.mxu1 %v1115_v8  ;;  %v1133_v30 = vld [vmem:[%s1522_s2] sm:$0xff]  ;;  %v1118_v43 = vld [vmem:[%s1518_s3 + $0x50] sm:$0xff]  ;;  %v1109_v44 = vld [vmem:[%s1518_s3 + $0x8] sm:$0xff] }
   0xa   :  { %331 = vmatpush.bf16.msrb.mxu0 %v1129_v4  ;;  %239 = vmatpush.bf16.msra.mxu2 %v1123_v9  ;;  %v1112_v35 = vld [vmem:[%s1518_s3 + $0x20] sm:$0xff]  ;;  %v1117_v45 = vld [vmem:[%s1518_s3 + $0x48] sm:$0xff]  ;;  %v1126_v1 = vld [vmem:[%s1518_s3 + $0x90] sm:$0xff] }
   0xb   :  { %v1120_v36 = vld [vmem:[%s1518_s3 + $0x60] sm:$0xff]  ;;  %280 = vmatpush.bf16.msra.mxu3 %v1126_v1  ;;  %v1125_v2 = vld [vmem:[%s1518_s3 + $0x88] sm:$0xff]  ;;  %v1132_v4 = vld [vmem:[%s1518_s3 + $0xb8] sm:$0xff] }
   0xc   :  { %v1131_v5 = vld [vmem:[%s1518_s3 + $0xb0] sm:$0xff]  ;;  %v1186_v6 = vld [vmem:[%s1520_s4 + $0x3] ss:$0 sm:$0xff]  ;;  %v1188_v11 = vld [vmem:[%s1520_s4 + $0x1] ss:$0 sm:$0xff] }
   0xd   :  { %227 = vmatpush.bf16.msra.mxu1 %v1114_v15  ;;  %v1187_v12 = vld [vmem:[%s1520_s4 + $0x5] ss:$0 sm:$0xff] }
   0xe   :  { %332 = vmatpush.bf16.msrb.mxu0 %v1128_v10  ;;  %240 = vmatpush.bf16.msra.mxu2 %v1122_v16 }
   0xf   :  { %281 = vmatpush.bf16.msra.mxu3 %v1125_v2 }
  0x11   :  { %228 = vmatpush.bf16.msra.mxu1 %v1113_v21 }
  0x12   :  { %443 = vmatpush.bf16.msra.mxu0 %v1137_v14  ;;  %241 = vmatpush.bf16.msra.mxu2 %v1121_v22 }
  0x13   :  { %384 = vmatpush.bf16.msrb.mxu3 %v1132_v4  ;;  %v1190_v4 = vld [vmem:[%s1520_s4 + $0x4] ss:$0 sm:$0xff] }
  0x15   :  { %973 = vmatmul.msk.bf16.vlgmr.msrb.gmra.mxu0 %vm321_vm1, %v960_v17  ;;  %229 = vmatpush.bf16.msra.mxu1 %v1112_v35 }
  0x16   :  { %444 = vmatpush.bf16.msra.mxu0 %v1136_v20  ;;  %242 = vmatpush.bf16.msra.mxu2 %v1120_v36  ;;  %v1138_v36 = vld [vmem:[%s1518_s3 + $0xd8] sm:$0xff] }
  0x17   :  { %385 = vmatpush.bf16.msrb.mxu3 %v1131_v5 }
  0x19   :  { %230 = vmatpush.bf16.msra.mxu1 %v1111_v40 }
  0x1a   :  { %445 = vmatpush.bf16.msra.mxu0 %v1135_v23  ;;  %243 = vmatpush.bf16.msra.mxu2 %v1119_v41 }
  0x1d   :  { %231 = vmatpush.bf16.msra.mxu1 %v1110_v42 }
  0x1e   :  { %244 = vmatpush.bf16.msra.mxu2 %v1118_v43 }
  0x21   :  { %232 = vmatpush.bf16.msra.mxu1 %v1109_v44 }
  0x22   :  { %245 = vmatpush.bf16.msra.mxu2 %v1117_v45 }
  0x25   :  { %1003 = vmatmul.msk.bf16.vlgmr.msra.gmra.mxu0 %vm321_vm1, %v1133_v30 }
  0x35   :  { %1004 = vmatmul.msk.bf16.gmra.mxu0 %vm321_vm1, %v990_v39 }
  0x82   :  { %v51_v3 = vpop.f32.mrf.mxu0 }
  0x83   :  { %v52_v13 = vadd.f32 %v1185_v7, %v51_v3 }
  0x85   :  { %1197 = vtanh.f32 %v52_v13 }
  0x8a   :  { %v53_v18 = vpop.f32.mrf.mxu0 }
  0x8b   :  { %v54_v19 = vadd.f32 %v1185_v7, %v53_v18  ;;  %v1198_v24 = vpop.eup %1197 }
  0x8c   :  { %v59_v27 = vrot.slane %v1198_v24, 2  ;;  %v67_v32 = vrot.slane %v1198_v24, 6  ;;  %v63_v33 = vrot.slane %v1198_v24, 4 }
  0x8d   :  { %1199 = vtanh.f32 %v54_v19 }
  0x92   :  { %v334_v62 = vpop.f32.mrf.mxu0 }
  0x93   :  { %v1200_v25 = vpop.eup %1199  ;;  %v335_v7 = vadd.f32 %v1186_v6, %v334_v62 }
  0x94   :  { %v80_v26 = vrot.slane %v1200_v25, 6  ;;  %v72_v28 = vrot.slane %v1200_v25, 2  ;;  %v76_v31 = vrot.slane %v1200_v25, 4 }
  0x95   :  { %1201 = vtanh.f32 %v335_v7 }
  0x96   :  { %81 = vrot.lane.b32.xlu1 %v80_v26, %s1233_s29  ;;  %v1165_v29 = vpack.i.bf16 %v59_v27, %v72_v28  ;;  %v1170_v34 = vpack.i.bf16 %v63_v33, %v76_v31 }
  0x98   :  { %1166 = vrot.lane.b32.xlu0 %v1165_v29, %s1234_s0  ;;  %v1139_v29 = vld [vmem:[%s1518_s3 + $0xe0] sm:$0xff] }
  0x9a   :  { %v336_v63 = vpop.f32.mrf.mxu0 }
  0x9b   :  { %v337_v8 = vadd.f32 %v1186_v6, %v336_v63  ;;  %v1202_v13 = vpop.eup %1201 }
  0x9c   :  { %v344_v23 = vrot.slane %v1202_v13, 6 }
  0x9d   :  { %1203 = vtanh.f32 %v337_v8 }
  0x9e   :  { %68 = vrot.lane.b32.xlu1 %v67_v32, %s1233_s29 }
  0xa0   :  { %1171 = vrot.lane.b32.xlu0 %v1170_v34, %s1235_s7 }
  0xa2   :  { %v447_v0 = vpop.f32.mrf.mxu0 }
  0xa3   :  { %v1204_v15 = vpop.eup %1203  ;;  %v448_v16 = vadd.f32 %v1187_v12, %v447_v0 }
  0xaa   :  { %v449_v3 = vpop.f32.mrf.mxu0 }
  0xab   :  { %v450_v19 = vadd.f32 %v1187_v12, %v449_v3 }
  0xb2   :  { %v452_v9 = vpop.f32.mrf.mxu0 }
  0xb3   :  { %v453_v21 = vadd.f32 %v1187_v12, %v452_v9  ;;  %v1191_v9 = vld [vmem:[%s1520_s4 + $0x6] ss:$0 sm:$0xff] }
  0xba   :  { %v454_v17 = vpop.f32.mrf.mxu0 }
 0x108   :  { %v82_v47 = vpop.permute.xlu1 %81 }
 0x10a   :  { %v1167_v46 = vpop.permute.xlu0 %1166 }
 0x10b   :  { %v1169_v48 = vunpack.i.h.bf16 %v1167_v46  ;;  %v1168_v49 = vunpack.i.l.bf16 %v1167_v46 }
 0x10d   :  { %v85_v53 = vsel %vm84_vm2, %v1198_v24, %v1169_v48  ;;  %v90_v54 = vsel %vm84_vm2, %v1200_v25, %v1168_v49  ;;  %v345_v24 = vrot.slane %v1204_v15, 6  ;;  %v455_v25 = vadd.f32 %v1187_v12, %v454_v17  ;;  %v1147_v12 = vld [vmem:[%s1518_s3 + $0x120] sm:$0xff]  ;;  %v1152_v17 = vld [vmem:[%s1518_s3 + $0x148] sm:$0xff] }
 0x10e   :  { %697 = vmatpush.bf16.msrb.mxu1 %v1147_v12 }
 0x10f   :  { %v346_v26 = vsel %vm343_vm5, %v344_v23, %v345_v24 }
 0x110   :  { %v69_v55 = vpop.permute.xlu1 %68  ;;  %v348_v31 = vmax.f32 %v1202_v13, %v346_v26  ;;  %v1153_v13 = vld [vmem:[%s1518_s3 + $0x150] sm:$0xff] }
 0x111   :  { %712 = vmatpush.bf16.msrb.mxu2 %v1153_v13 }
 0x112   :  { %v1172_v50 = vpop.permute.xlu0 %1171  ;;  %v350_v37 = vrot.slane %v348_v31, 2  ;;  %v353_v43 = vrot.slane %v348_v31, 4 }
 0x113   :  { %v1174_v51 = vunpack.i.h.bf16 %v1172_v50  ;;  %v1173_v52 = vunpack.i.l.bf16 %v1172_v50 }
 0x114   :  { %v352_v42 = vmax.f32 %v348_v31, %v350_v37 }
 0x115   :  { %v87_v56 = vsel %vm86_vm3, %v85_v53, %v1174_v51  ;;  %v91_v57 = vsel %vm86_vm3, %v90_v54, %v1173_v52  ;;  %713 = vmatpush.bf16.msrb.mxu2 %v1152_v17 }
 0x116   :  { %v89_v58 = vsel %vm88_vm4, %v87_v56, %v69_v55  ;;  %v92_v59 = vsel %vm88_vm4, %v91_v57, %v82_v47  ;;  %v355_v47 = vmax.f32 %v352_v42, %v353_v43  ;;  %v1141_v42 = vld [vmem:[%s1518_s3 + $0xf0] sm:$0xff]  ;;  %v1148_v43 = vld [vmem:[%s1518_s3 + $0x128] sm:$0xff] }
 0x117   :  { %v93_v60 = vpack.c.bf16 %v89_v58, %v89_v58  ;;  %v94_v61 = vpack.c.bf16 %v92_v59, %v92_v59 }
 0x118   :  { %v356_v52 = vpack.c.bf16 %v355_v47, %v355_v47 }
 0x119   :  { %233 = vmatmul.bf16.vlgmr.msra.gmra.mxu1 %v93_v60  ;;  %246 = vmatmul.bf16.vlgmr.msra.gmra.mxu2 %v94_v61 }
 0x196   :  { %v234_v10 = vpop.f32.mrf.mxu1 }
 0x197   :  { %v235_v14 = vadd.f32 %v1188_v11, %v234_v10 }
 0x19c   :  { %v247_v18 = vpop.f32.mrf.mxu2 }
 0x19d   :  { %v248_v20 = vadd.f32 %v247_v18, %v235_v14 }
 0x19e   :  { %v236_v22 = vpop.f32.mrf.mxu1 }
 0x19f   :  { %1205 = vtanh.f32 %v248_v20  ;;  %v1145_v20 = vld [vmem:[%s1518_s3 + $0x110] sm:$0xff] }
 0x1a0   :  { %1207 = vtanh.f32 %v448_v16  ;;  %v1146_v16 = vld [vmem:[%s1518_s3 + $0x118] sm:$0xff] }
 0x1a1   :  { %1209 = vtanh.f32 %v450_v19  ;;  %698 = vmatpush.bf16.msrb.mxu1 %v1146_v16 }
 0x1a2   :  { %1211 = vtanh.f32 %v453_v21  ;;  %v1151_v21 = vld [vmem:[%s1518_s3 + $0x140] sm:$0xff] }
 0x1a3   :  { %1213 = vtanh.f32 %v455_v25  ;;  %714 = vmatpush.bf16.msrb.mxu2 %v1151_v21  ;;  %v1194_v21 = vld [vmem:[%s1520_s4 + $0x9] ss:$0 sm:$0xff] }
 0x1a4   :  { %v249_v27 = vpop.f32.mrf.mxu2 }
 0x1a5   :  { %v1206_v28 = vpop.eup %1205  ;;  %699 = vmatpush.bf16.msrb.mxu1 %v1145_v20  ;;  %v1158_v20 = vld [vmem:[%s1518_s3 + $0x178] sm:$0xff] }
 0x1a6   :  { %v1208_v30 = vpop.eup %1207  ;;  %v252_v32 = vpack.c.bf16 %v1206_v28, %v1206_v28  ;;  %v1144_v28 = vld [vmem:[%s1518_s3 + $0x108] sm:$0xff] }
 0x1a7   :  { %v1210_v33 = vpop.eup %1209  ;;  %v466_v38 = vrot.slane %v1208_v30, 2 }
 0x1a8   :  { %v1212_v34 = vpop.eup %1211  ;;  %956 = vmatmul.msk.bf16.vlgmr.msra.gmra.mxu3 %vm84_vm2, %v252_v32  ;;  %v467_v39 = vrot.slane %v1210_v33, 2 }
 0x1a9   :  { %v1214_v35 = vpop.eup %1213  ;;  %529 = vmatpush.bf16.msra.mxu3 %v1139_v29  ;;  %v469_v40 = vrot.slane %v1212_v34, 2  ;;  %700 = vmatpush.bf16.msrb.mxu1 %v1144_v28  ;;  %v1195_v28 = vld [vmem:[%s1520_s4 + $0xa] ss:$0 sm:$0xff] }
 0x1aa   :  { %v471_v41 = vrot.slane %v1214_v35, 2  ;;  %v468_v44 = vsel %vm465_vm6, %v466_v38, %v467_v39  ;;  %v1143_v38 = vld [vmem:[%s1518_s3 + $0x100] sm:$0xff] }
 0x1ab   :  { %v470_v45 = vsel %vm465_vm6, %v467_v39, %v469_v40  ;;  %v477_v48 = vmax.f32 %v1208_v30, %v468_v44  ;;  %v1150_v39 = vld [vmem:[%s1518_s3 + $0x138] sm:$0xff]  ;;  %v1140_v44 = vld [vmem:[%s1518_s3 + $0xe8] sm:$0xff] }
 0x1ac   :  { %v472_v46 = vsel %vm465_vm6, %v469_v40, %v471_v41  ;;  %v478_v49 = vmax.f32 %v1210_v33, %v470_v45  ;;  %v480_v51 = vmax.f32 %v1214_v35, %v471_v41  ;;  %715 = vmatpush.bf16.msrb.mxu2 %v1150_v39  ;;  %v1142_v40 = vld [vmem:[%s1518_s3 + $0xf8] sm:$0xff]  ;;  %v1149_v41 = vld [vmem:[%s1518_s3 + $0x130] sm:$0xff]  ;;  %v1155_v45 = vld [vmem:[%s1518_s3 + $0x160] sm:$0xff] }
 0x1ad   :  { %530 = vmatpush.bf16.msra.mxu3 %v1138_v36  ;;  %v479_v50 = vmax.f32 %v1212_v34, %v472_v46  ;;  %v486_v53 = vrot.slane %v477_v48, 4  ;;  %701 = vmatpush.bf16.msrb.mxu1 %v1143_v38 }
 0x1ae   :  { %v487_v54 = vrot.slane %v478_v49, 4  ;;  %v491_v56 = vrot.slane %v480_v51, 4 }
 0x1af   :  { %v489_v55 = vrot.slane %v479_v50, 4 }
 0x1b0   :  { %v488_v58 = vsel %vm485_vm7, %v486_v53, %v487_v54  ;;  %716 = vmatpush.bf16.msrb.mxu2 %v1149_v41 }
 0x1b1   :  { %v492_v57 = vsel %vm485_vm7, %v489_v55, %v491_v56  ;;  %v490_v59 = vsel %vm485_vm7, %v487_v54, %v489_v55  ;;  %v496_v61 = vmax.f32 %v477_v48, %v488_v58  ;;  %702 = vmatpush.bf16.msrb.mxu1 %v1142_v40 }
 0x1b2   :  { %v498_v60 = vmax.f32 %v479_v50, %v492_v57  ;;  %v497_v62 = vmax.f32 %v478_v49, %v490_v59 }
 0x1b4   :  { %v499_v63 = vmax.f32 %v496_v61, %v497_v62  ;;  %v500_v0 = vmax.f32 %v497_v62, %v498_v60  ;;  %717 = vmatpush.bf16.msrb.mxu2 %v1148_v43  ;;  %v1154_v60 = vld [vmem:[%s1518_s3 + $0x158] sm:$0xff]  ;;  %v1157_v61 = vld [vmem:[%s1518_s3 + $0x170] sm:$0xff]  ;;  %v1156_v62 = vld [vmem:[%s1518_s3 + $0x168] sm:$0xff] }
 0x1b5   :  { %703 = vmatpush.bf16.msrb.mxu1 %v1141_v42  ;;  %789 = vmatpush.bf16.msrb.mxu0 %v1157_v61 }
 0x1b6   :  { %v501_v1 = vpack.c.bf16 %v500_v0, %v499_v63  ;;  %v1192_v63 = vld [vmem:[%s1520_s4 + $0x7] ss:$0 sm:$0xff] }
 0x1b8   :  { %982 = vmatmul.msk.bf16.vlgmr.msrb.gmra.mxu3 %vm84_vm2, %v356_v52 }
 0x1b9   :  { %704 = vmatpush.bf16.msrb.mxu1 %v1140_v44  ;;  %752 = vmatpush.bf16.msrb.mxu3 %v1155_v45 }
 0x1ba   :  { %790 = vmatpush.bf16.msrb.mxu0 %v1156_v62 }
 0x1bd   :  { %753 = vmatpush.bf16.msrb.mxu3 %v1154_v60 }
 0x1c8   :  { %1013 = vmatmul.msk.bf16.vlgmr.msra.gmra.mxu3 %vm84_vm2, %v501_v1 }
 0x22b   :  { %v1406_v2 = vpop.f32.mrf.mxu3 }
 0x233   :  { %v285_v3 = vpop.f32.mrf.mxu3 }
 0x23b   :  { %v387_v5 = vpop.f32.mrf.mxu3 }
 0x23c   :  { %v388_v6 = vadd.f32 %v1190_v4, %v387_v5 }
 0x23e   :  { %1215 = vtanh.f32 %v388_v6 }
 0x243   :  { %v389_v7 = vpop.f32.mrf.mxu3 }
 0x244   :  { %v1216_v8 = vpop.eup %1215 }
 0x245   :  { %v540_v10 = vrot.slane %v1216_v8, 6  ;;  %v542_v15 = vrot.slane %v1216_v8, 4  ;;  %v544_v22 = vrot.slane %v1216_v8, 2 }
 0x247   :  { %v546_v18 = vsel %vm343_vm5, %v1216_v8, %v540_v10  ;;  %v1189_v10 = vld [vmem:[%s1520_s4 + $0x2] ss:$0 sm:$0xff] }
 0x248   :  { %v547_v19 = vsel %vm485_vm7, %v546_v18, %v542_v15  ;;  %v284_v12 = vadd.f32 %v1189_v10, %v1406_v2  ;;  %v1161_v2 = vld [vmem:[%s1518_s3 + $0x190] sm:$0xff] }
 0x249   :  { %v548_v25 = vsel %vm465_vm6, %v547_v19, %v544_v22  ;;  %861 = vmatpush.bf16.msra.mxu3 %v1161_v2 }
 0x24b   :  { %v532_v11 = vpop.f32.mrf.mxu3 }
 0x24c   :  { %v533_v14 = vadd.f32 %v1191_v9, %v532_v11  ;;  %v1193_v11 = vld [vmem:[%s1520_s4 + $0x8] ss:$0 sm:$0xff] }
 0x24e   :  { %1217 = vtanh.f32 %v533_v14 }
 0x253   :  { %v534_v23 = vpop.f32.mrf.mxu3 }
 0x254   :  { %v1218_v24 = vpop.eup %1217  ;;  %v535_v26 = vadd.f32 %v1191_v9, %v534_v23  ;;  %v1159_v9 = vld [vmem:[%s1518_s3 + $0x180] sm:$0xff] }
 0x255   :  { %v549_v27 = vmul.f32 %v1218_v24, %v548_v25  ;;  %825 = vmatpush.bf16.msra.mxu2 %v1159_v9 }
 0x256   :  { %1219 = vtanh.f32 %v535_v26 }
 0x257   :  { %v560_v29 = vrot.slane %v549_v27, 6  ;;  %v552_v32 = vrot.slane %v549_v27, 2  ;;  %v556_v36 = vrot.slane %v549_v27, 4 }
 0x259   :  { %561 = vrot.lane.b32.xlu0 %v560_v29, %s1233_s29  ;;  %826 = vmatpush.bf16.msra.mxu2 %v1158_v20 }
 0x25c   :  { %v1220_v30 = vpop.eup %1219 }
 0x25d   :  { %v550_v31 = vmul.f32 %v1220_v30, %v547_v19 }
 0x25f   :  { %v565_v33 = vrot.slane %v550_v31, 2  ;;  %v569_v35 = vrot.slane %v550_v31, 4 }
 0x261   :  { %v1175_v34 = vpack.i.bf16 %v552_v32, %v565_v33  ;;  %v1180_v37 = vpack.i.bf16 %v556_v36, %v569_v35 }
 0x263   :  { %1176 = vrot.lane.b32.xlu2 %v1175_v34, %s1234_s0  ;;  %v1196_v34 = vld [vmem:[%s1520_s4 + $0xb] ss:$0 sm:$0xff] }
 0x26b   :  { %1181 = vrot.lane.b32.xlu2 %v1180_v37, %s1235_s7 }
 0x2bd   :  { %v1177_v46 = vpop.permute.xlu2 %1176 }
 0x2be   :  { %v1178_v47 = vunpack.i.l.bf16 %v1177_v46  ;;  %v1179_v49 = vunpack.i.h.bf16 %v1177_v46 }
 0x2c0   :  { %v576_v51 = vsel %vm84_vm2, %v550_v31, %v1178_v47  ;;  %v573_v55 = vsel %vm84_vm2, %v549_v27, %v1179_v49  ;;  %v1160_v27 = vld [vmem:[%s1518_s3 + $0x188] sm:$0xff] }
 0x2c1   :  { %862 = vmatpush.bf16.msra.mxu3 %v1160_v27 }
 0x2c5   :  { %v1182_v48 = vpop.permute.xlu2 %1181 }
 0x2c6   :  { %v1183_v50 = vunpack.i.l.bf16 %v1182_v48  ;;  %v1184_v52 = vunpack.i.h.bf16 %v1182_v48 }
 0x2c8   :  { %v577_v53 = vsel %vm86_vm3, %v576_v51, %v1183_v50  ;;  %v574_v57 = vsel %vm86_vm3, %v573_v55, %v1184_v52 }
 0x2c9   :  { %v579_v54 = vpack.c.bf16 %v577_v53, %v577_v53 }
 0x2cb   :  { %v562_v56 = vpop.permute.xlu0 %561  ;;  %1070 = vmatmul.msk.bf16.vlgmr.msrb.gmra.mxu2 %vm88_vm4, %v579_v54 }
 0x2cc   :  { %v575_v58 = vsel %vm88_vm4, %v574_v57, %v562_v56 }
 0x2cd   :  { %v578_v59 = vpack.c.bf16 %v575_v58, %v575_v58 }
 0x2cf   :  { %705 = vmatmul.bf16.vlgmr.msrb.gmra.mxu1 %v578_v59 }
 0x34c   :  { %v706_v0 = vpop.f32.mrf.mxu1 }
 0x34d   :  { %v707_v1 = vadd.f32 %v1192_v63, %v706_v0 }
 0x34e   :  { %v719_v3 = vpop.f32.mrf.mxu2 }
 0x34f   :  { %v720_v4 = vadd.f32 %v719_v3, %v707_v1 }
 0x351   :  { %1221 = vtanh.f32 %v720_v4 }
 0x352   :  { %1223 = vtanh.f32 %v284_v12 }
 0x354   :  { %v708_v5 = vpop.f32.mrf.mxu1 }
 0x356   :  { %v721_v6 = vpop.f32.mrf.mxu2 }
 0x357   :  { %v1222_v7 = vpop.eup %1221 }
 0x358   :  { %v724_v8 = vpack.c.bf16 %v1222_v7, %v1222_v7  ;;  %v1224_v15 = vpop.eup %1223 }
 0x35a   :  { %1079 = vmatmul.msk.bf16.vlgmr.msrb.gmra.mxu3 %vm84_vm2, %v724_v8 }
 0x3dd   :  { %v755_v13 = vpop.f32.mrf.mxu3 }
 0x3de   :  { %v756_v14 = vadd.f32 %v1193_v11, %v755_v13 }
 0x3e0   :  { %1225 = vtanh.f32 %v756_v14 }
 0x3e5   :  { %v757_v16 = vpop.f32.mrf.mxu3 }
 0x3e6   :  { %v1226_v17 = vpop.eup %1225 }
 0x3e7   :  { %v760_v18 = vadd.f32 %v1226_v17, %v1224_v15 }
 0x3e9   :  { %v761_v19 = vpack.c.bf16 %v760_v18, %v760_v18 }
 0x3eb   :  { %1088 = vmatmul.msk.bf16.vlgmr.msrb.gmra.mxu0 %vm84_vm2, %v761_v19 }
 0x468   :  { %v792_v22 = vpop.f32.mrf.mxu0 }
 0x469   :  { %v793_v23 = vadd.f32 %v1194_v21, %v792_v22 }
 0x46b   :  { %1227 = vtanh.f32 %v793_v23 }
 0x470   :  { %v794_v24 = vpop.f32.mrf.mxu0 }
 0x471   :  { %v1228_v25 = vpop.eup %1227 }
 0x472   :  { %v797_v26 = vpack.c.bf16 %v1228_v25, %v1228_v25 }
 0x474   :  { %1097 = vmatmul.msk.bf16.vlgmr.msra.gmra.mxu2 %vm84_vm2, %v797_v26 }
 0x4f7   :  { %v828_v29 = vpop.f32.mrf.mxu2 }
 0x4f8   :  { %v829_v30 = vadd.f32 %v1195_v28, %v828_v29 }
 0x4fa   :  { %1229 = vtanh.f32 %v829_v30 }
 0x4ff   :  { %v830_v31 = vpop.f32.mrf.mxu2 }
 0x500   :  { %v1230_v32 = vpop.eup %1229 }
 0x501   :  { %v833_v33 = vpack.c.bf16 %v1230_v32, %v1230_v32 }
 0x503   :  { %1106 = vmatmul.msk.bf16.vlgmr.msra.gmra.mxu3 %vm84_vm2, %v833_v33 }
 0x586   :  { %v864_v35 = vpop.f32.mrf.mxu3 }
 0x587   :  { %v865_v36 = vadd.f32 %v1196_v34, %v864_v35 }
 0x589   :  { %1231 = vtanh.f32 %v865_v36 }
 0x58e   :  { %v866_v37 = vpop.f32.mrf.mxu3 }
 0x58f   :  { %v1232_v38 = vpop.eup %1231 }
 0x590   :  { %870 = vst.msk [vmem:[%s1523_s5] sm:$0x3] %vm869_vm8, %v1232_v38 }

</bundles_post_ra>
